<compile_context>
chip_gen: v6e
topology: v6e:2x2x1
jax: 0.10.0
libtpu: 0.0.40
codegen_flags: <defaults>
</compile_context>

<pallas_src>
import jax
import jax.numpy as jnp
from jax.experimental import pallas as pl
from jax.experimental.pallas import tpu as pltpu


def _residual_downsample_kernel(x_ref, w_ref, o_ref):
    """One (batch, row-tile) grid step.

    x_ref : (TR, 2, Wo, 2*C)  axis 1 = top/bottom row of each 2x2 window;
                              lanes hold [col0 channels | col1 channels].
    w_ref : (C, C2)           1x1-conv weight (resident in VMEM).
    o_ref : (TR, Wo, C2)
    """
    c, c2 = w_ref.shape
    # --- 2x2 max-pool: dense elementwise max (VPU), no strided gathers ---
    rowmax = jnp.maximum(x_ref[:, 0, :, :], x_ref[:, 1, :, :])   # (TR, Wo, 2C)
    pooled = jnp.maximum(rowmax[..., :c], rowmax[..., c:])       # (TR, Wo, C)
    tr, wo, _ = pooled.shape
    # --- 1x1 conv == channel matmul on the MXU, f32 accumulation ---
    out = jnp.dot(pooled.reshape(tr * wo, c), w_ref[...],
                  preferred_element_type=jnp.float32)            # (TR*Wo, C2)
    o_ref[...] = out.reshape(tr, wo, c2).astype(o_ref.dtype)


def _choose_row_tile(Ho, Wo, C, C2, itemsize,
                     vmem_tile_budget=12 * 1024 * 1024,
                     target_positions=1024):
    """Row tile: ~512-1024 output positions, double-buffered tiles <= budget."""
    # bytes per output row (single-buffered): input window rows + output row
    bytes_per_row = 2 * Wo * (4 * C + C2) * itemsize
    tr = min(Ho,
             max(1, vmem_tile_budget // max(1, bytes_per_row)),
             max(1, target_positions // max(1, Wo)))
    tr = max(1, tr)
    while Ho % tr:          # keep blocks uniform (correct either way)
        tr -= 1
    return tr


def residual_downsample_nhwc(x_nhwc, w_conv):
    """Fused MaxPool2d(2,2) + 1x1 Conv (no bias), channels-last in/out."""
    B, H, W, C = x_nhwc.shape
    C2 = w_conv.shape[0]
    Ho, Wo = H // 2, W // 2
    # PyTorch MaxPool2d floors odd spatial dims: drop trailing row/col if odd.
    if (H != 2 * Ho) or (W != 2 * Wo):
        x_nhwc = x_nhwc[:, :2 * Ho, :2 * Wo, :]
    # Metadata-only reshape (no HBM pass): (B,H,W,C) -> (B, Ho, 2, Wo, 2*C)
    x_win = x_nhwc.reshape(B, Ho, 2, Wo, 2 * C)
    # PyTorch conv weight (2C, C, 1, 1) -> matmul weight (C, 2C)
    w_mat = jnp.transpose(w_conv.reshape(C2, C), (1, 0)).astype(x_nhwc.dtype)

    itemsize = jnp.dtype(x_nhwc.dtype).itemsize
    TR = _choose_row_tile(Ho, Wo, C, C2, itemsize)

    in_tile = TR * 2 * Wo * 2 * C * itemsize
    out_tile = TR * Wo * C2 * itemsize
    w_bytes = C * C2 * itemsize
    # Double-buffered tiles + resident weight + headroom; cap well under the
    # v7x per-core physical VMEM (64 MiB).
    vmem_limit = 2 * (in_tile + out_tile) + 2 * w_bytes + (4 << 20)
    vmem_limit = int(min(max(vmem_limit, 16 << 20), 56 << 20))

    out = pl.pallas_call(
        _residual_downsample_kernel,
        out_shape=jax.ShapeDtypeStruct((B, Ho, Wo, C2), x_nhwc.dtype),
        grid=(B, Ho // TR),
        in_specs=[
            pl.BlockSpec((None, TR, 2, Wo, 2 * C),
                         lambda b, r: (b, r, 0, 0, 0)),
            # constant index_map: weight DMA'd once, stays resident in VMEM
            pl.BlockSpec((C, C2), lambda b, r: (0, 0)),
        ],
        out_specs=pl.BlockSpec((None, TR, Wo, C2), lambda b, r: (b, r, 0, 0)),
        compiler_params=pltpu.CompilerParams(
            dimension_semantics=("parallel", "parallel"),
            vmem_limit_bytes=vmem_limit,
        ),
    )(x_win, w_mat)
    return out  # (B, Ho, Wo, 2C)


def residual_downsample(x_nchw, w_conv):
    """NCHW adapter matching the PyTorch module interface.

    The two transposes below are boundary layout glue only; an NHWC pipeline
    should call residual_downsample_nhwc directly and avoid them entirely.
    """
    x_nhwc = jnp.transpose(x_nchw, (0, 2, 3, 1))
    out = residual_downsample_nhwc(x_nhwc, w_conv)
    return jnp.transpose(out, (0, 3, 1, 2))


def _reference(x_nchw, w_conv):
    # Pure-JAX reference: maxpool 2x2 stride 2 + 1x1 conv (no bias).
    C2 = w_conv.shape[0]
    pooled = jax.lax.reduce_window(
        x_nchw, -jnp.inf, jax.lax.max,
        window_dimensions=(1, 1, 2, 2),
        window_strides=(1, 1, 2, 2),
        padding="VALID",
    )
    w2 = w_conv.reshape(C2, -1)                        # (2C, C)
    return jnp.einsum("bchw,oc->bohw", pooled, w2)


if __name__ == "__main__":
    B, C, H, W = 2, 4, 16, 16
    key = jax.random.PRNGKey(0)
    kx, kw = jax.random.split(key)

    x = jax.random.normal(kx, (B, C, H, W), dtype=jnp.float32)
    # Deterministic synthetic weight for Conv2d(C, 2C, 1, bias=False): (2C, C, 1, 1)
    w_conv = (jax.random.normal(kw, (2 * C, C, 1, 1), dtype=jnp.float32)
              * (1.0 / jnp.sqrt(C)))

    out = residual_downsample(x, w_conv)
    out = jax.block_until_ready(out)

    ref = _reference(x, w_conv)
    assert out.shape == (B, 2 * C, H // 2, W // 2), out.shape
    assert jnp.allclose(out, ref, atol=1e-5, rtol=1e-5), "mismatch vs reference"

    print("KERNEL_OK")
</pallas_src>

<mosaic_0001>
module attributes {stable_mosaic.version = 11 : i64} {
  func.func @_residual_downsample_kernel(%arg0: i32, %arg1: i32, %arg2: memref<1x8x2x8x8xf32, #tpu.memory_space<vmem>>, %arg3: memref<4x8xf32, #tpu.memory_space<vmem>>, %arg4: memref<1x8x8x8xf32, #tpu.memory_space<vmem>>) attributes {dimension_semantics = [#tpu.dimension_semantics<parallel>, #tpu.dimension_semantics<parallel>], iteration_bounds = array<i64: 2, 1>, scalar_prefetch = 0 : i64, scratch_operands = 0 : i64, tpu.core_type = #tpu.core_type<tc>, window_params = [{transform_indices = @transform_0, window_bounds = array<i64: 1, 8, 2, 8, 8>}, {pipeline_mode = #tpu.pipeline_mode<synchronous>, transform_indices = @transform_1, window_bounds = array<i64: 4, 8>}, {transform_indices = @transform_2, window_bounds = array<i64: 1, 8, 8, 8>}]} {
    %c0 = arith.constant 0 : index
    %c0_0 = arith.constant 0 : index
    %c0_1 = arith.constant 0 : index
    %c0_2 = arith.constant 0 : index
    %c0_3 = arith.constant 0 : index
    %0 = vector.load %arg2[%c0, %c0_0, %c0_1, %c0_2, %c0_3] : memref<1x8x2x8x8xf32, #tpu.memory_space<vmem>>, vector<1x8x1x8x8xf32>
    %1 = vector.shape_cast %0 : vector<1x8x1x8x8xf32> to vector<8x8x8xf32>
    %c0_4 = arith.constant 0 : index
    %c0_5 = arith.constant 0 : index
    %c1 = arith.constant 1 : index
    %c0_6 = arith.constant 0 : index
    %c0_7 = arith.constant 0 : index
    %2 = vector.load %arg2[%c0_4, %c0_5, %c1, %c0_6, %c0_7] : memref<1x8x2x8x8xf32, #tpu.memory_space<vmem>>, vector<1x8x1x8x8xf32>
    %3 = vector.shape_cast %2 : vector<1x8x1x8x8xf32> to vector<8x8x8xf32>
    %4 = arith.maximumf %1, %3 : vector<8x8x8xf32>
    %5 = vector.extract_strided_slice %4 {offsets = [0, 0, 0], sizes = [8, 8, 4], strides = [1, 1, 1]} : vector<8x8x8xf32> to vector<8x8x4xf32>
    %6 = vector.extract_strided_slice %4 {offsets = [0, 0, 4], sizes = [8, 8, 4], strides = [1, 1, 1]} : vector<8x8x8xf32> to vector<8x8x4xf32>
    %7 = arith.maximumf %5, %6 : vector<8x8x4xf32>
    %8 = vector.shape_cast %7 : vector<8x8x4xf32> to vector<64x4xf32>
    %c0_8 = arith.constant 0 : index
    %c0_9 = arith.constant 0 : index
    %9 = vector.load %arg3[%c0_8, %c0_9] : memref<4x8xf32, #tpu.memory_space<vmem>>, vector<4x8xf32>
    %cst = arith.constant dense<0.000000e+00> : vector<64x8xf32>
    %10 = tpu.matmul %8, %9, %cst {dimension_numbers = #tpu.dot_dimension_numbers<[1], [0], [0], [1], [0, 0, 1, 1], [], []>} : vector<64x4xf32>, vector<4x8xf32>, vector<64x8xf32> -> vector<64x8xf32>
    %11 = vector.shape_cast %10 : vector<64x8xf32> to vector<8x8x8xf32>
    %c0_10 = arith.constant 0 : index
    %c0_11 = arith.constant 0 : index
    %c0_12 = arith.constant 0 : index
    %c0_13 = arith.constant 0 : index
    %12 = vector.load %arg4[%c0_10, %c0_11, %c0_12, %c0_13] : memref<1x8x8x8xf32, #tpu.memory_space<vmem>>, vector<1x8x8x8xf32>
    %13 = vector.shape_cast %12 : vector<1x8x8x8xf32> to vector<8x8x8xf32>
    %14 = vector.shape_cast %11 : vector<8x8x8xf32> to vector<1x8x8x8xf32>
    tpu.vector_store %arg4[%c0_10, %c0_11, %c0_12, %c0_13], %14 {strides = array<i32>} : memref<1x8x8x8xf32, #tpu.memory_space<vmem>>, vector<1x8x8x8xf32>,
    return
  }
  func.func @transform_0(%arg0: i32, %arg1: i32) -> (i32, i32, i32, i32, i32) {
    %c0_i32 = arith.constant 0 : i32
    %c0_i32_0 = arith.constant 0 : i32
    %c0_i32_1 = arith.constant 0 : i32
    %c0_i32_2 = arith.constant 0 : i32
    return %arg0, %arg1, %c0_i32, %c0_i32_0, %c0_i32_1 : i32, i32, i32, i32, i32
  }
  func.func @transform_1(%arg0: i32, %arg1: i32) -> (i32, i32) {
    %c0_i32 = arith.constant 0 : i32
    %c0_i32_0 = arith.constant 0 : i32
    %c0_i32_1 = arith.constant 0 : i32
    return %c0_i32, %c0_i32_0 : i32, i32
  }
  func.func @transform_2(%arg0: i32, %arg1: i32) -> (i32, i32, i32, i32) {
    %c0_i32 = arith.constant 0 : i32
    %c0_i32_0 = arith.constant 0 : i32
    %c0_i32_1 = arith.constant 0 : i32
    return %arg0, %arg1, %c0_i32, %c0_i32_0 : i32, i32, i32, i32
  }
}

</mosaic_0001>

<bundles_post_ra>
// kernel: tpu_custom_call.1
= control target key start
LH: loop header
LB: loop body
LE: loop exit
PB: predicated region body
PF: predicated region fallthrough
CT: control target
= control target key end

     0   :  { %7 = vsyncpa [#allocation3], 0  ;;  %s1036_s0 = inlined_call_operand.hbm [shape: f32[2,8,2,8,8], index: 0, kind: input, shape index: {}]   ;;  %s1037_s1 = inlined_call_operand.hbm [shape: f32[4,8], index: 1, kind: input, shape index: {}]   ;;  %s1038_s2 = inlined_call_operand.hbm [shape: f32[2,8,8,8], index: 2, kind: output, shape index: {}]  }
   0x1   :  { %9 = vsyncpa [#allocation3 + $0x1], 0 }
   0x2   :  { %10 = vsyncpa [#allocation6], 0 }
   0x3   :  { %11 = vsyncpa [#allocation4], 0 }
   0x4   :  { %13 = vsyncpa [#allocation4 + $0x1], 0  ;;  %s820_s9 = smov 0   ;;  %s822_s10 = smov 0  }
   0x5   :  { %s824_s11 = smov 0   ;;  %s826_s12 = smov 0  }
   0x6   :  { %s828_s13 = smov 0   ;;  %s830_s14 = smov 0  }
   0x7 LB: > { %s518_s15 = sadd.s32 4294967295, %s795_s14   ;;  %s519_s16 = sadd.s32 4294967294, %s795_s14   ;;  %s795_s14 = sphi %s830_s14, %s19_s14   ;;  %s791_s13 = sphi %s828_s13, %s1057_s13   ;;  %s787_s12 = sphi %s826_s12, %s1056_s12   ;;  %s783_s11 = sphi %s824_s11, %s1055_s11   ;;  %s779_s10 = sphi %s822_s10, %s1054_s10   ;;  %s775_s9 = sphi %s820_s9, %s1053_s9  }
   0x8   : > { %s40_s17 = sadd.s32 1, %s783_s11  ;;  %p47_p0 = scmp.ne.s32.totalorder %s783_s11, %s779_s10 }
   0x9   : > { %p48_p1 = scmp.eq.s32.totalorder %s795_s14, 0  ;;  %p53_p2 = scmp.ne.s32.totalorder %s779_s10, %s775_s9 }
   0xa   : > { %p858_p3 = scmp.eq.s32.totalorder %s518_s15, 0  ;;  %p100_p4 = scmp.eq.s32.totalorder %s518_s15, 1 }
   0xb   : > { %p862_p5 = por %p48_p1, %p47_p0  ;;  %p106_p6 = scmp.eq.s32.totalorder %s519_s16, 1 }
   0xc   : > { %p868_p7 = por %p858_p3, %p53_p2  ;;  %p872_p8 = por %p100_p4, %p47_p0 }
   0xd   : > { %p876_p9 = por %p106_p6, %p53_p2  ;;  %p520_p10 = scmp.ge.s32.totalorder %s795_s14, 1 }
   0xe   : > { %s1043_s20 = scalar_select %p868_p7, 1, 0 }
   0xf   : > { %s1044_s21 = scalar_select %p872_p8, 1, 0 }
  0x10   : > { %s1045_s22 = scalar_select %p876_p9, 1, 0 }
  0x11   : > { %p113_p11 = scmp.lt.s32.totalorder %s795_s14, 3  ;;  %s797_s24 = smov [#allocation5]  }
  0x12   : > { %s126_s25 = sshll.u32 %s797_s24, 4  ;;  %p600_p1 = scmp.lt.s32.totalorder %s795_s14, 2  ;;  %s127_s25 = int_to_ptr.vmem [resolvable:$true] %s126_s25 }
  0x13   : > { %p883_p13 = pnand %p520_p10, %p113_p11  ;;  %s31_s28 = sadd.s32 1, %s791_s13 }
  0x14   : > { %p892_p4 = pnand %p600_p1, %p862_p5  ;;  %p33_p6 = scmp.ge.s32.totalorder %s31_s28, 2 }
  0x15   : > { %p587_p0 = pneg %p883_p13  ;;  %s137_s29 = sand.u32 1, %s783_s11  }
  0x16   : > { %s668_s30 = scalar_lea.vmem %s127_s25, 64  ;;  %p676_p8 = scmp.lt.s32.totalorder %s127_s25, %s127_s25 }
  0x17   : > { %p898_p2 = pnand %p587_p0, %p858_p3  ;;  %p669_p11 = scmp.ne.s32.totalorder %s127_s25, %s668_s30 }
  0x18   : > { %p677_p5 = scmp.lt.s32.totalorder %s668_s30, %s668_s30 }
  0x19   : > { %p659_p10 = pneg %p898_p2 }
  0x1a   : > { %p678_p1 = por %p677_p5, %p676_p8 }
  0x1b   : > { %p671_p12 = pnand %p669_p11, %p659_p10 }
  0x1d   : > { %p672_p9 = pneg %p671_p12 }
  0x1f   : > { %p679_p7 = pnand %p678_p1, %p672_p9 }
  0x21   : > { %682 = shalt.err (!%p679_p7)
}
  0x22   : > { %590 = dma.hbm_to_vmem [thread:$0]  (!%p898_p2), %s1037_s1, 64, %s127_s25, [#allocation6]  }
  0x23   : > { %s1059_s28 = smov (%p33_p6, %s31_s28), 0  ;;  %s523_s5 = sshll.u32 %s137_s29, 7 }
  0x24   : > { %s35_s6 = ssub.s32 %s791_s13, %s1059_s28  ;;  %s552_s7 = sshll.u32 %s791_s13, 11 }
  0x25   : > { %p38_p12 = scmp.eq.s32.totalorder %s35_s6, 0  ;;  %s150_s16 = scalar_lea.hbm %s1036_s0, %s552_s7 }
  0x26   : > { %s141_s19 = scalar_lea.vmem [#allocation2], %s523_s5  ;;  %s138_s30 = scalar_lea.sflag [#allocation3], %s137_s29 }
  0x27   : > { %s151_s24 = sshll.u32 %s141_s19, 4  ;;  %p685_p7 = pneg %p892_p4  ;;  %s152_s24 = int_to_ptr.vmem [resolvable:$true] %s151_s24 }
  0x28   : > { %s922_s27 = scalar_select %p38_p12, %s783_s11, %s40_s17  }
  0x29   : > { %s696_s25 = scalar_lea.vmem %s152_s24, 2048  ;;  %s798_s3 = smov [#allocation2]  }
  0x2a   : > { %p697_p8 = scmp.ne.s32.totalorder %s152_s24, %s696_s25  ;;  %s701_s4 = sshll.u32 %s798_s3, 4  ;;  %s702_s4 = int_to_ptr.vmem [resolvable:$false] %s701_s4 }
  0x2b   : > { %s703_s6 = scalar_lea.vmem %s702_s4, 4096  ;;  %p704_p2 = scmp.lt.s32.totalorder %s152_s24, %s702_s4 }
  0x2c   : > { %p699_p9 = pnand %p697_p8, %p685_p7  ;;  %p705_p6 = scmp.lt.s32.totalorder %s703_s6, %s696_s25 }
  0x2e   : > { %p700_p0 = pneg %p699_p9  ;;  %p706_p10 = por %p705_p6, %p704_p2 }
  0x30   : > { %p707_p11 = pnand %p706_p10, %p700_p0 }
  0x32   : > { %710 = shalt.err (!%p707_p11)
}
  0x33   : > { %s799_s5 = smov 128   ;;  %s800_s17 = smov 8  }
  0x34   : > { %594 = dma.hbm_to_vmem [thread:$0]  (!%p892_p4), %s150_s16, 2048, %s152_s24, %s138_s30, %s799_s5, %s799_s5, %s800_s17  }
  0x35   : > { %163 = sbr.rel (%p883_p13) target bundleno = 403 (0x193), region = 28  ;;  %s931_s29 = sand.u32 (!%p883_p13), 1, %s779_s10  }
  0x36   : > { %s527_s7 = sshll.u32 (!%p883_p13), %s931_s29, 7  ;;  %s166_s8 = scalar_lea.sflag (!%p883_p13), [#allocation3], %s931_s29 }
  0x37   : > { %s935_s15 = scalar_lea.vmem (!%p883_p13), [#allocation2], %s527_s7  ;;  %p1049_p5 = scmp.ne.s32.totalorder (!%p883_p13), %s1043_s20, 0 }
  0x3a   : > { %762 = dma.done.wait (%p1049_p5), %s166_s8, 2048  }
  0x3b   : > { %764 = vsyncadd (%p1049_p5), %s166_s8, 4294965248 }
  0x3c   : > { %766 = dma.done.wait (%p858_p3), [#allocation6], 64  }
  0x3d   : > { %768 = vsyncadd (%p858_p3), [#allocation6], 4294967232  ;;  %v197_v0 = vld [vmem:[%s935_s15 + $0x10] sm:$0xff]  ;;  %v531_v1 = vld [vmem:[%s935_s15 + $0x18] sm:$0xff]  ;;  %s801_s18 = smov 124   ;;  %vm287_vm0 = vcmask 1043456  }
  0x3e   : > { %v196_v2 = vld [vmem:[%s935_s15] sm:$0xff]  ;;  %v214_v3 = vmax.f32 %v197_v0, %v531_v1  ;;  %v530_v4 = vld [vmem:[%s935_s15 + $0x8] sm:$0xff]  ;;  %v201_v5 = vld [vmem:[%s935_s15 + $0x50] sm:$0xff]  ;;  %vm262_vm1 = vcmask 31744   ;;  %s529_s20 = sshll.u32 %s931_s29, 6  ;;  %vm396_vm2 = vcmask 64512  }
  0x3f   : > { %v535_v6 = vld [vmem:[%s935_s15 + $0x58] sm:$0xff]  ;;  %v213_v7 = vmax.f32 %v196_v2, %v530_v4  ;;  %v200_v8 = vld [vmem:[%s935_s15 + $0x40] sm:$0xff]  ;;  %v534_v9 = vld [vmem:[%s935_s15 + $0x48] sm:$0xff]  ;;  %s193_s23 = scalar_lea.vmem [#allocation7], %s529_s20  ;;  %s553_s16 = sshll.u32 %s787_s12, 10 }
  0x40   : > { %231 = vrot.lane.b32.xlu1 %v214_v3, %s801_s18  ;;  %v218_v10 = vmax.f32 %v201_v5, %v535_v6  ;;  %v217_v11 = vmax.f32 %v200_v8, %v534_v9  ;;  %v202_v12 = vld [vmem:[%s935_s15 + $0x60] sm:$0xff]  ;;  %v536_v13 = vld [vmem:[%s935_s15 + $0x68] sm:$0xff]  ;;  %v203_v19 = vld [vmem:[%s935_s15 + $0x70] sm:$0xff]  ;;  %s421_s26 = sshll.u32 %s193_s23, 4  ;;  %s985_s30 = scalar_lea.hbm %s1038_s2, %s553_s16  ;;  %s979_s26 = int_to_ptr.vmem [resolvable:$true] %s421_s26 }
  0x41   : > { %229 = vrot.lane.b32.xlu0 %v213_v7, %s801_s18  ;;  %v198_v14 = vld [vmem:[%s935_s15 + $0x20] sm:$0xff]  ;;  %v532_v15 = vld [vmem:[%s935_s15 + $0x28] sm:$0xff]  ;;  %v219_v17 = vmax.f32 %v202_v12, %v536_v13  ;;  %v537_v20 = vld [vmem:[%s935_s15 + $0x78] sm:$0xff]  ;;  %s406_s12 = scalar_lea.sflag [#allocation4], %s931_s29  ;;  %s711_s25 = scalar_lea.vmem %s979_s26, 1024 }
  0x42   : > { %v261_v16 = vld [vmem:[#allocation5] sm:$0xf]  ;;  %v215_v18 = vmax.f32 %v198_v14, %v532_v15  ;;  %v199_v21 = vld [vmem:[%s935_s15 + $0x30] sm:$0xff]  ;;  %v533_v22 = vld [vmem:[%s935_s15 + $0x38] sm:$0xff]  ;;  %v220_v23 = vmax.f32 %v203_v19, %v537_v20  ;;  %p712_p3 = scmp.ne.s32.totalorder %s979_s26, %s711_s25  ;;  %p1050_p13 = scmp.ne.s32.totalorder %s1044_s21, 0 }
  0x43   : > { %563 = vmatprep.subr.msk.mxu0 %vm287_vm0, %v261_v16  ;;  %577 = vmatprep.subr.msk.mxu1 %vm287_vm0, %v261_v16  ;;  %v216_v24 = vmax.f32 %v199_v21, %v533_v22  ;;  %s802_s3 = smov [#allocation7]  }
  0x44   : > { %239 = vrot.lane.b32.xlu1 %v218_v10, %s801_s18  ;;  %564 = vmatpush3.msk.msra.mxu0 %vm287_vm0, %v261_v16  ;;  %p713_p4 = pnand %p712_p3, %p1050_p13  ;;  %s715_s4 = sshll.u32 %s802_s3, 4  ;;  %s716_s4 = int_to_ptr.vmem [resolvable:$false] %s715_s4 }
  0x45   : > { %237 = vrot.lane.b32.xlu0 %v217_v11, %s801_s18  ;;  %578 = vmatpush3.msk.msra.mxu1 %vm287_vm0, %v261_v16  ;;  %s717_s6 = scalar_lea.vmem %s716_s4, 2048  ;;  %p718_p12 = scmp.lt.s32.totalorder %s979_s26, %s716_s4 }
  0x46   : > { %p714_p1 = pneg %p713_p4  ;;  %p719_p7 = scmp.lt.s32.totalorder %s717_s6, %s711_s25 }
  0x48   : > { %241 = vrot.lane.b32.xlu1 %v219_v17, %s801_s18  ;;  %p720_p8 = por %p719_p7, %p718_p12 }
  0x49   : > { %233 = vrot.lane.b32.xlu0 %v215_v18, %s801_s18 }
  0x4a   : > { %p721_p9 = pnand %p720_p8, %p714_p1 }
  0x4c   : > { %243 = vrot.lane.b32.xlu1 %v220_v23, %s801_s18 }
  0x4d   : > { %235 = vrot.lane.b32.xlu0 %v216_v24, %s801_s18 }
  0xb2   : > { %v232_v25 = vpop.permute.xlu1 %231 }
  0xb3   : > { %v254_v26 = vmax.f32 %v214_v3, %v232_v25  ;;  %v230_v27 = vpop.permute.xlu0 %229 }
  0xb4   : > { %v253_v28 = vmax.f32 %v213_v7, %v230_v27 }
  0xb6   : > { %565 = vmatprep.mubr.msk.f32.mxu0 %vm262_vm1, %v253_v28  ;;  %v240_v29 = vpop.permute.xlu1 %239 }
  0xb7   : > { %v258_v30 = vmax.f32 %v218_v10, %v240_v29  ;;  %566 = vmatmul.mubr.msk.f32.vlgmr.msra.gmra.mxu0 %vm262_vm1, %v254_v26  ;;  %v238_v31 = vpop.permute.xlu0 %237 }
  0xb8   : > { %v257_v32 = vmax.f32 %v217_v11, %v238_v31 }
  0xba   : > { %571 = vmatprep.mubr.msk.f32.mxu1 %vm262_vm1, %v257_v32  ;;  %v242_v33 = vpop.permute.xlu1 %241 }
  0xbb   : > { %v259_v34 = vmax.f32 %v219_v17, %v242_v33  ;;  %572 = vmatmul.mubr.msk.f32.vlgmr.msra.gmra.mxu1 %vm262_vm1, %v258_v30  ;;  %v234_v35 = vpop.permute.xlu0 %233 }
  0xbc   : > { %v255_v36 = vmax.f32 %v215_v18, %v234_v35 }
  0xbd   : > { %574 = vmatprep.mubr.msk.f32.mxu1 %vm262_vm1, %v259_v34 }
  0xbe   : > { %568 = vmatprep.mubr.msk.f32.mxu0 %vm262_vm1, %v255_v36  ;;  %v244_v37 = vpop.permute.xlu1 %243 }
  0xbf   : > { %v260_v38 = vmax.f32 %v220_v23, %v244_v37  ;;  %v236_v39 = vpop.permute.xlu0 %235 }
  0xc0   : > { %v256_v40 = vmax.f32 %v216_v24, %v236_v39 }
  0xc1   : > { %575 = vmatmul.mubr.msk.f32.gmra.mxu1 %vm262_vm1, %v260_v38 }
  0xc2   : > { %569 = vmatmul.mubr.msk.f32.gmra.mxu0 %vm262_vm1, %v256_v40 }
 0x177   : > { %v567_v41 = vpop.f32.mrf.mxu0 }
 0x178   : > { %398 = vst.msk [vmem:[%s193_s23 + $0x8] sm:$0xff] %vm396_vm2, %v567_v41 }
 0x179   : > { %v357_v42 = vpop.f32.mrf.mxu0 }
 0x17a   : > { %397 = vst.msk [vmem:[%s193_s23] sm:$0xff] %vm396_vm2, %v357_v42 }
 0x17b   : > { %v573_v43 = vpop.f32.mrf.mxu1 }
 0x17c   : > { %402 = vst.msk [vmem:[%s193_s23 + $0x28] sm:$0xff] %vm396_vm2, %v573_v43 }
 0x17d   : > { %v377_v44 = vpop.f32.mrf.mxu1 }
 0x17e   : > { %401 = vst.msk [vmem:[%s193_s23 + $0x20] sm:$0xff] %vm396_vm2, %v377_v44 }
 0x181   : > { %v576_v45 = vpop.f32.mrf.mxu1 }
 0x182   : > { %v570_v46 = vpop.f32.mrf.mxu0  ;;  %404 = vst.msk [vmem:[%s193_s23 + $0x38] sm:$0xff] %vm396_vm2, %v576_v45 }
 0x183   : > { %400 = vst.msk [vmem:[%s193_s23 + $0x18] sm:$0xff] %vm396_vm2, %v570_v46  ;;  %v387_v47 = vpop.f32.mrf.mxu1 }
 0x184   : > { %v367_v48 = vpop.f32.mrf.mxu0  ;;  %403 = vst.msk [vmem:[%s193_s23 + $0x30] sm:$0xff] %vm396_vm2, %v387_v47 }
 0x185   : > { %399 = vst.msk [vmem:[%s193_s23 + $0x10] sm:$0xff] %vm396_vm2, %v367_v48 }
 0x186   : > { %724 = shalt.err (!%p721_p9)
}
 0x187   : > { %s725_s5 = scalar_lea.hbm %s985_s30, 1024  ;;  %s729_s8 = scalar_lea.hbm %s1038_s2, 2048 }
 0x188   : > { %p726_p0 = scmp.ne.s32.totalorder %s985_s30, %s725_s5  ;;  %p730_p10 = scmp.lt.s32.totalorder %s985_s30, %s1038_s2 }
 0x189   : > { %p731_p11 = scmp.lt.s32.totalorder %s729_s8, %s725_s5 }
 0x18a   : > { %p727_p2 = pnand %p726_p0, %p1050_p13 }
 0x18b   : > { %p732_p5 = por %p731_p11, %p730_p10 }
 0x18c   : > { %p728_p6 = pneg %p727_p2 }
 0x18e   : > { %p733_p3 = pnand %p732_p5, %p728_p6 }
 0x190   : > { %736 = shalt.err (!%p733_p3)
}
 0x191   : > { %s803_s20 = smov 128   ;;  %s804_s23 = smov 8  }
 0x192   : > { %585 = dma.vmem_to_hbm [thread:$0]  (%p1050_p13), %s979_s26, 1024, %s985_s30, %s406_s12, %s803_s20, %s803_s20, %s804_s23  }
 0x193 PF: > { %s436_s16 = sand.u32 1, %s775_s9   ;;  %p1051_p4 = scmp.ne.s32.totalorder %s1045_s22, 0 }
 0x194   : > { %p1052_p1 = scmp.ge.s32.totalorder %s795_s14, 2  ;;  %s437_s19 = scalar_lea.sflag [#allocation4], %s436_s16 }
 0x196   : > { %p596_p12 = pnand %p1052_p1, %p1051_p4 }
 0x198   : > { %p597_p7 = pneg %p596_p12 }
 0x19a   : > { %770 = dma.done.wait (%p597_p7), %s437_s19, 1024  }
 0x19b   : > { %772 = vsyncadd (%p597_p7), %s437_s19, 4294966272  ;;  %s19_s14 = sadd.s32 1, %s795_s14   ;;  %s1053_s9 = smov %s779_s10 }
 0x19c   : > { %p16_p8 = scmp.ge.s32.totalorder %s19_s14, 4   ;;  %s1054_s10 = smov %s783_s11 }
 0x19d   : > { %s1055_s11 = smov %s922_s27  ;;  %s1056_s12 = smov %s791_s13 }
 0x19e   : > { %s1057_s13 = smov %s1059_s28  ;;  %18 = sbr.rel (!%p16_p8) target bundleno = 7 (0x7), region = 78 }
 0x1a3   :  { %442 = vsyncpa [#allocation3], 1 }
 0x1a4   :  { %444 = vsyncpa [#allocation3 + $0x1], 1 }
 0x1a5   :  { %445 = vsyncpa [#allocation6], 1 }
 0x1a6   :  { %446 = vsyncpa [#allocation4], 1 }
 0x1a7   :  { %448 = vsyncpa [#allocation4 + $0x1], 1 }

</bundles_post_ra>
